<compile_context>
chip_gen: v6e
topology: v6e:2x2x1
jax: 0.10.0
libtpu: 0.0.40
codegen_flags: <defaults>
</compile_context>

<pallas_src>
import functools

import jax
import jax.numpy as jnp
from jax import lax
from jax.experimental import pallas as pl
from jax.experimental.pallas import tpu as pltpu


# 32 MiB scoped VMEM: safe on v5e/v6e (128 MiB physical) and leaves headroom on
# v7x (64 MiB physical).  The fused per-image tiles below are far smaller.
_VMEM_LIMIT_BYTES = 32 * 1024 * 1024


# ------------------------------ fused kernel -------------------------------- #

def _bottleneck_kernel(x_ref, rc_ref, w1_ref, b1_ref, w2_ref, b2_ref,
                       w3_ref, b3_ref, o_ref, *, H, W, compute_dtype):
    """Fused Bottleneck for one image in channel-major (C, H*W) layout."""
    HW = H * W
    x = x_ref[0]                                    # (Cin, HW): conv1 input + residual
    xc = x.astype(compute_dtype)

    # ---- conv1 (1x1) + folded bn1 + relu ------------------------------------
    y1 = jnp.dot(w1_ref[...], xc, preferred_element_type=jnp.float32)
    y1 = jnp.maximum(y1 + b1_ref[...], 0.0)
    y1c = y1.astype(compute_dtype)                  # (planes, HW)

    # ---- conv2 (3x3, stride=1, pad=1) + folded bn2 + relu -------------------
    # Pixel row/col ids along the lane axis (precomputed in the wrapper, so no
    # in-kernel div/mod or layout-crossing reshape is needed).
    rc = rc_ref[...]                                # (2, HW) int32
    prow = rc[0:1, :]
    pcol = rc[1:2, :]
    not_top = prow >= 1          # source row exists for dy == 0
    not_bot = prow <= H - 2      # source row exists for dy == 2
    not_left = pcol >= 1         # source col exists for dx == 0
    not_right = pcol <= W - 2    # source col exists for dx == 2

    taps = []
    for dy in range(3):                             # static unroll over 9 taps
        for dx in range(3):
            s = (dy - 1) * W + (dx - 1)             # flat source-pixel offset
            t = y1c
            if s != 0:
                # t[:, p] = y1c[:, p + s]  (lane rotation -> XLU slot)
                t = pltpu.roll(t, shift=(-s) % HW, axis=1)
            mask = None
            if dy == 0:
                mask = not_top
            elif dy == 2:
                mask = not_bot
            if dx == 0:
                mask = not_left if mask is None else jnp.logical_and(mask, not_left)
            elif dx == 2:
                mask = not_right if mask is None else jnp.logical_and(mask, not_right)
            if mask is not None:
                # Zero wrapped pixels in the (bf16) INPUT before the matmul:
                # no garbage * weight contributions and no 0*inf hazard.
                t = jnp.where(mask, t, jnp.zeros_like(t))
            taps.append(t)
    y1_cat = jnp.concatenate(taps, axis=0)          # (9*planes, HW)

    y2 = jnp.dot(w2_ref[...], y1_cat, preferred_element_type=jnp.float32)
    y2 = jnp.maximum(y2 + b2_ref[...], 0.0)
    y2c = y2.astype(compute_dtype)                  # (planes, HW)

    # ---- conv3 (1x1) + folded bn3 + residual add + relu ---------------------
    y3 = jnp.dot(w3_ref[...], y2c, preferred_element_type=jnp.float32)
    y3 = y3 + b3_ref[...] + x.astype(jnp.float32)
    o_ref[0] = jnp.maximum(y3, 0.0).astype(o_ref.dtype)


# --------------------------- parameters / forward ---------------------------- #

def _fold_bn(gamma, beta, mean, var, eps=1e-5):
    scale = gamma / jnp.sqrt(var + eps)
    bias = beta - mean * scale
    return scale, bias


def init_params(key, inplanes, planes):
    ks = jax.random.split(key, 6)

    def bn_params(k, c):
        k1, k2, k3, k4 = jax.random.split(k, 4)
        gamma = jax.random.uniform(k1, (c,), jnp.float32, 0.5, 1.5)
        beta = 0.1 * jax.random.normal(k2, (c,), jnp.float32)
        mean = 0.1 * jax.random.normal(k3, (c,), jnp.float32)
        var = jax.random.uniform(k4, (c,), jnp.float32, 0.5, 1.5)
        return gamma, beta, mean, var

    return {
        # conv weights in PyTorch OIHW layout (bias=False)
        "w1": 0.1 * jax.random.normal(ks[0], (planes, inplanes, 1, 1), jnp.float32),
        "bn1": bn_params(ks[1], planes),
        "w2": 0.1 * jax.random.normal(ks[2], (planes, planes, 3, 3), jnp.float32),
        "bn2": bn_params(ks[3], planes),
        "w3": 0.1 * jax.random.normal(ks[4], (planes * 4, planes, 1, 1), jnp.float32),
        "bn3": bn_params(ks[5], planes * 4),
    }


def bottleneck_forward(x_nchw, params, compute_dtype=jnp.bfloat16):
    """Pallas Bottleneck.forward (inference BN, downsample=None, stride=1)."""
    N, C, H, W = x_nchw.shape
    planes = params["w1"].shape[0]
    cout = 4 * planes
    # Residual add is only shape-consistent when inplanes == 4*planes, stride=1.
    assert C == cout, "Bottleneck identity residual requires inplanes == 4 * planes"
    HW = H * W

    s1, b1 = _fold_bn(*params["bn1"])
    s2, b2 = _fold_bn(*params["bn2"])
    s3, b3 = _fold_bn(*params["bn3"])

    # Fold the BN scale into the conv weights (per output-channel row).
    w1 = (params["w1"][:, :, 0, 0] * s1[:, None]).astype(compute_dtype)          # (planes, Cin)
    # OIHW -> (O, dy, dx, I) -> (O, 9*I); column block t = dy*3+dx matches the
    # kernel's tap concatenation order.
    w2 = jnp.transpose(params["w2"], (0, 2, 3, 1)).reshape(planes, 9 * planes)
    w2 = (w2 * s2[:, None]).astype(compute_dtype)                                 # (planes, 9*planes)
    w3 = (params["w3"][:, :, 0, 0] * s3[:, None]).astype(compute_dtype)           # (Cout, planes)

    # Pixel row/col ids for the in-kernel halo masks (tiny constant input).
    pid = jnp.arange(HW, dtype=jnp.int32)
    rowcol = jnp.stack([pid // W, pid % W], axis=0)                               # (2, HW)

    x3 = x_nchw.reshape(N, C, HW)                                                 # free reshape (NCHW kept)

    kern = functools.partial(_bottleneck_kernel, H=H, W=W, compute_dtype=compute_dtype)
    out = pl.pallas_call(
        kern,
        out_shape=jax.ShapeDtypeStruct((N, cout, HW), x_nchw.dtype),
        grid=(N,),
        in_specs=[
            pl.BlockSpec((1, C, HW), lambda n: (n, 0, 0)),           # x / residual
            pl.BlockSpec((2, HW), lambda n: (0, 0)),                 # row/col ids
            pl.BlockSpec((planes, C), lambda n: (0, 0)),             # w1 (BN1-folded)
            pl.BlockSpec((planes, 1), lambda n: (0, 0)),             # b1
            pl.BlockSpec((planes, 9 * planes), lambda n: (0, 0)),    # w2 (BN2-folded, 9 taps on K)
            pl.BlockSpec((planes, 1), lambda n: (0, 0)),             # b2
            pl.BlockSpec((cout, planes), lambda n: (0, 0)),          # w3 (BN3-folded)
            pl.BlockSpec((cout, 1), lambda n: (0, 0)),               # b3
        ],
        out_specs=pl.BlockSpec((1, cout, HW), lambda n: (n, 0, 0)),
        compiler_params=pltpu.CompilerParams(
            dimension_semantics=("parallel",),
            vmem_limit_bytes=_VMEM_LIMIT_BYTES),
    )(x3, rowcol, w1, b1.reshape(planes, 1), w2, b2.reshape(planes, 1),
      w3, b3.reshape(cout, 1))

    return out.reshape(N, cout, H, W)                                             # free reshape


# -------------------------------- reference ---------------------------------- #

def reference_forward(x, params, eps=1e-5):
    def bn(y, p):
        g, b, m, v = p
        rs = lambda a: a.reshape(1, -1, 1, 1)
        return (y - rs(m)) / jnp.sqrt(rs(v) + eps) * rs(g) + rs(b)

    dn = ("NCHW", "OIHW", "NCHW")
    prec = lax.Precision.HIGHEST
    out = lax.conv_general_dilated(x, params["w1"], (1, 1), "VALID",
                                   dimension_numbers=dn, precision=prec)
    out = jax.nn.relu(bn(out, params["bn1"]))
    out = lax.conv_general_dilated(out, params["w2"], (1, 1), "SAME",
                                   dimension_numbers=dn, precision=prec)
    out = jax.nn.relu(bn(out, params["bn2"]))
    out = lax.conv_general_dilated(out, params["w3"], (1, 1), "VALID",
                                   dimension_numbers=dn, precision=prec)
    out = jax.nn.relu(bn(out, params["bn3"]) + x)
    return out


# ----------------------------------- main ------------------------------------ #

if __name__ == "__main__":
    inplanes, planes = 64, 16          # expansion=4 -> inplanes == 4*planes
    N, H, W = 8, 16, 16                # 8 grid steps -> 4 per TensorCore on v7x

    key = jax.random.PRNGKey(0)
    kx, kp = jax.random.split(key)
    x = jax.random.normal(kx, (N, inplanes, H, W), jnp.float32)   # NCHW like PyTorch
    params = init_params(kp, inplanes, planes)

    ref = jax.block_until_ready(reference_forward(x, params))

    # f32-operand path: structural check of the fused kernel (roll offsets,
    # halo masks, tap/weight ordering, BN fold, residual, ReLU).
    out_f32 = jax.block_until_ready(
        bottleneck_forward(x, params, compute_dtype=jnp.float32))
    assert out_f32.shape == (N, 4 * planes, H, W)
    assert jnp.allclose(out_f32, ref, rtol=1e-2, atol=1e-2), "f32 mismatch vs reference"

    # bf16 matmul-operand path (MXU fast path); three chained bf16 layers ->
    # looser tolerance.
    out_bf16 = jax.block_until_ready(
        bottleneck_forward(x, params, compute_dtype=jnp.bfloat16))
    assert out_bf16.shape == (N, 4 * planes, H, W)
    assert jnp.allclose(out_bf16, ref, rtol=1e-1, atol=2e-1), "bf16 mismatch vs reference"

    print("KERNEL_OK")
</pallas_src>

<mosaic_0001>
module attributes {stable_mosaic.version = 11 : i64} {
  func.func @_bottleneck_kernel(%arg0: i32, %arg1: memref<1x64x256xf32, #tpu.memory_space<vmem>>, %arg2: memref<2x256xi32, #tpu.memory_space<vmem>>, %arg3: memref<16x64xf32, #tpu.memory_space<vmem>>, %arg4: memref<16x1xf32, #tpu.memory_space<vmem>>, %arg5: memref<16x144xf32, #tpu.memory_space<vmem>>, %arg6: memref<16x1xf32, #tpu.memory_space<vmem>>, %arg7: memref<64x16xf32, #tpu.memory_space<vmem>>, %arg8: memref<64x1xf32, #tpu.memory_space<vmem>>, %arg9: memref<1x64x256xf32, #tpu.memory_space<vmem>>) attributes {dimension_semantics = [#tpu.dimension_semantics<parallel>], iteration_bounds = array<i64: 8>, scalar_prefetch = 0 : i64, scratch_operands = 0 : i64, tpu.core_type = #tpu.core_type<tc>, window_params = [{transform_indices = @transform_0, window_bounds = array<i64: 1, 64, 256>}, {pipeline_mode = #tpu.pipeline_mode<synchronous>, transform_indices = @transform_1, window_bounds = array<i64: 2, 256>}, {pipeline_mode = #tpu.pipeline_mode<synchronous>, transform_indices = @transform_2, window_bounds = array<i64: 16, 64>}, {pipeline_mode = #tpu.pipeline_mode<synchronous>, transform_indices = @transform_3, window_bounds = array<i64: 16, 1>}, {pipeline_mode = #tpu.pipeline_mode<synchronous>, transform_indices = @transform_4, window_bounds = array<i64: 16, 144>}, {pipeline_mode = #tpu.pipeline_mode<synchronous>, transform_indices = @transform_5, window_bounds = array<i64: 16, 1>}, {pipeline_mode = #tpu.pipeline_mode<synchronous>, transform_indices = @transform_6, window_bounds = array<i64: 64, 16>}, {pipeline_mode = #tpu.pipeline_mode<synchronous>, transform_indices = @transform_7, window_bounds = array<i64: 64, 1>}, {transform_indices = @transform_8, window_bounds = array<i64: 1, 64, 256>}]} {
    %c0 = arith.constant 0 : index
    %c0_0 = arith.constant 0 : index
    %c0_1 = arith.constant 0 : index
    %0 = vector.load %arg1[%c0, %c0_0, %c0_1] : memref<1x64x256xf32, #tpu.memory_space<vmem>>, vector<1x64x256xf32>
    %1 = vector.shape_cast %0 : vector<1x64x256xf32> to vector<64x256xf32>
    %c0_2 = arith.constant 0 : index
    %c0_3 = arith.constant 0 : index
    %2 = vector.load %arg3[%c0_2, %c0_3] : memref<16x64xf32, #tpu.memory_space<vmem>>, vector<16x64xf32>
    %cst = arith.constant dense<0.000000e+00> : vector<16x256xf32>
    %3 = tpu.matmul %2, %1, %cst {dimension_numbers = #tpu.dot_dimension_numbers<[1], [0], [0], [1], [0, 0, 1, 1], [], []>} : vector<16x64xf32>, vector<64x256xf32>, vector<16x256xf32> -> vector<16x256xf32>
    %c0_4 = arith.constant 0 : index
    %c0_5 = arith.constant 0 : index
    %4 = vector.load %arg4[%c0_4, %c0_5] : memref<16x1xf32, #tpu.memory_space<vmem>>, vector<16x1xf32>
    %5 = vector.broadcast %4 : vector<16x1xf32> to vector<16x256xf32>
    %6 = arith.addf %3, %5 : vector<16x256xf32>
    %cst_6 = arith.constant 0.000000e+00 : f32
    %7 = vector.broadcast %cst_6 : f32 to vector<16x256xf32>
    %8 = arith.maximumf %6, %7 : vector<16x256xf32>
    %c0_7 = arith.constant 0 : index
    %c0_8 = arith.constant 0 : index
    %9 = vector.load %arg2[%c0_7, %c0_8] : memref<2x256xi32, #tpu.memory_space<vmem>>, vector<2x256xi32>
    %10 = vector.extract_strided_slice %9 {offsets = [0, 0], sizes = [1, 256], strides = [1, 1]} : vector<2x256xi32> to vector<1x256xi32>
    %11 = vector.extract_strided_slice %9 {offsets = [1, 0], sizes = [1, 256], strides = [1, 1]} : vector<2x256xi32> to vector<1x256xi32>
    %c1_i32 = arith.constant 1 : i32
    %12 = vector.broadcast %c1_i32 : i32 to vector<1x256xi32>
    %13 = arith.cmpi sge, %10, %12 : vector<1x256xi32>
    %c14_i32 = arith.constant 14 : i32
    %14 = vector.broadcast %c14_i32 : i32 to vector<1x256xi32>
    %15 = arith.cmpi sle, %10, %14 : vector<1x256xi32>
    %c1_i32_9 = arith.constant 1 : i32
    %16 = vector.broadcast %c1_i32_9 : i32 to vector<1x256xi32>
    %17 = arith.cmpi sge, %11, %16 : vector<1x256xi32>
    %c14_i32_10 = arith.constant 14 : i32
    %18 = vector.broadcast %c14_i32_10 : i32 to vector<1x256xi32>
    %19 = arith.cmpi sle, %11, %18 : vector<1x256xi32>
    %c17_i32 = arith.constant 17 : i32
    %20 = tpu.dynamic_rotate %8 by %c17_i32 dim 1 : vector<16x256xf32>, i32 -> vector<16x256xf32>
    %21 = arith.andi %13, %17 : vector<1x256xi1>
    %cst_11 = arith.constant 0.000000e+00 : f32
    %22 = vector.broadcast %cst_11 : f32 to vector<16x256xf32>
    %23 = vector.shape_cast %21 : vector<1x256xi1> to vector<1x256xi1>
    %24 = vector.broadcast %23 : vector<1x256xi1> to vector<16x256xi1>
    %25 = arith.select %24, %20, %22 : vector<16x256xi1>, vector<16x256xf32>
    %c16_i32 = arith.constant 16 : i32
    %26 = tpu.dynamic_rotate %8 by %c16_i32 dim 1 : vector<16x256xf32>, i32 -> vector<16x256xf32>
    %cst_12 = arith.constant 0.000000e+00 : f32
    %27 = vector.broadcast %cst_12 : f32 to vector<16x256xf32>
    %28 = vector.shape_cast %13 : vector<1x256xi1> to vector<1x256xi1>
    %29 = vector.broadcast %28 : vector<1x256xi1> to vector<16x256xi1>
    %30 = arith.select %29, %26, %27 : vector<16x256xi1>, vector<16x256xf32>
    %c15_i32 = arith.constant 15 : i32
    %31 = tpu.dynamic_rotate %8 by %c15_i32 dim 1 : vector<16x256xf32>, i32 -> vector<16x256xf32>
    %32 = arith.andi %13, %19 : vector<1x256xi1>
    %cst_13 = arith.constant 0.000000e+00 : f32
    %33 = vector.broadcast %cst_13 : f32 to vector<16x256xf32>
    %34 = vector.shape_cast %32 : vector<1x256xi1> to vector<1x256xi1>
    %35 = vector.broadcast %34 : vector<1x256xi1> to vector<16x256xi1>
    %36 = arith.select %35, %31, %33 : vector<16x256xi1>, vector<16x256xf32>
    %c1_i32_14 = arith.constant 1 : i32
    %37 = tpu.dynamic_rotate %8 by %c1_i32_14 dim 1 : vector<16x256xf32>, i32 -> vector<16x256xf32>
    %cst_15 = arith.constant 0.000000e+00 : f32
    %38 = vector.broadcast %cst_15 : f32 to vector<16x256xf32>
    %39 = vector.shape_cast %17 : vector<1x256xi1> to vector<1x256xi1>
    %40 = vector.broadcast %39 : vector<1x256xi1> to vector<16x256xi1>
    %41 = arith.select %40, %37, %38 : vector<16x256xi1>, vector<16x256xf32>
    %c255_i32 = arith.constant 255 : i32
    %42 = tpu.dynamic_rotate %8 by %c255_i32 dim 1 : vector<16x256xf32>, i32 -> vector<16x256xf32>
    %cst_16 = arith.constant 0.000000e+00 : f32
    %43 = vector.broadcast %cst_16 : f32 to vector<16x256xf32>
    %44 = vector.shape_cast %19 : vector<1x256xi1> to vector<1x256xi1>
    %45 = vector.broadcast %44 : vector<1x256xi1> to vector<16x256xi1>
    %46 = arith.select %45, %42, %43 : vector<16x256xi1>, vector<16x256xf32>
    %c241_i32 = arith.constant 241 : i32
    %47 = tpu.dynamic_rotate %8 by %c241_i32 dim 1 : vector<16x256xf32>, i32 -> vector<16x256xf32>
    %48 = arith.andi %15, %17 : vector<1x256xi1>
    %cst_17 = arith.constant 0.000000e+00 : f32
    %49 = vector.broadcast %cst_17 : f32 to vector<16x256xf32>
    %50 = vector.shape_cast %48 : vector<1x256xi1> to vector<1x256xi1>
    %51 = vector.broadcast %50 : vector<1x256xi1> to vector<16x256xi1>
    %52 = arith.select %51, %47, %49 : vector<16x256xi1>, vector<16x256xf32>
    %c240_i32 = arith.constant 240 : i32
    %53 = tpu.dynamic_rotate %8 by %c240_i32 dim 1 : vector<16x256xf32>, i32 -> vector<16x256xf32>
    %cst_18 = arith.constant 0.000000e+00 : f32
    %54 = vector.broadcast %cst_18 : f32 to vector<16x256xf32>
    %55 = vector.shape_cast %15 : vector<1x256xi1> to vector<1x256xi1>
    %56 = vector.broadcast %55 : vector<1x256xi1> to vector<16x256xi1>
    %57 = arith.select %56, %53, %54 : vector<16x256xi1>, vector<16x256xf32>
    %c239_i32 = arith.constant 239 : i32
    %58 = tpu.dynamic_rotate %8 by %c239_i32 dim 1 : vector<16x256xf32>, i32 -> vector<16x256xf32>
    %59 = arith.andi %15, %19 : vector<1x256xi1>
    %cst_19 = arith.constant 0.000000e+00 : f32
    %60 = vector.broadcast %cst_19 : f32 to vector<16x256xf32>
    %61 = vector.shape_cast %59 : vector<1x256xi1> to vector<1x256xi1>
    %62 = vector.broadcast %61 : vector<1x256xi1> to vector<16x256xi1>
    %63 = arith.select %62, %58, %60 : vector<16x256xi1>, vector<16x256xf32>
    %64 = tpu.concatenate %25, %30, %36, %41, %8, %46, %52, %57, %63 in 0 : vector<16x256xf32>, vector<16x256xf32>, vector<16x256xf32>, vector<16x256xf32>, vector<16x256xf32>, vector<16x256xf32>, vector<16x256xf32>, vector<16x256xf32>, vector<16x256xf32> -> vector<144x256xf32>
    %c0_20 = arith.constant 0 : index
    %c0_21 = arith.constant 0 : index
    %65 = vector.load %arg5[%c0_20, %c0_21] : memref<16x144xf32, #tpu.memory_space<vmem>>, vector<16x144xf32>
    %cst_22 = arith.constant dense<0.000000e+00> : vector<16x256xf32>
    %66 = tpu.matmul %65, %64, %cst_22 {dimension_numbers = #tpu.dot_dimension_numbers<[1], [0], [0], [1], [0, 0, 1, 1], [], []>} : vector<16x144xf32>, vector<144x256xf32>, vector<16x256xf32> -> vector<16x256xf32>
    %c0_23 = arith.constant 0 : index
    %c0_24 = arith.constant 0 : index
    %67 = vector.load %arg6[%c0_23, %c0_24] : memref<16x1xf32, #tpu.memory_space<vmem>>, vector<16x1xf32>
    %68 = vector.broadcast %67 : vector<16x1xf32> to vector<16x256xf32>
    %69 = arith.addf %66, %68 : vector<16x256xf32>
    %cst_25 = arith.constant 0.000000e+00 : f32
    %70 = vector.broadcast %cst_25 : f32 to vector<16x256xf32>
    %71 = arith.maximumf %69, %70 : vector<16x256xf32>
    %c0_26 = arith.constant 0 : index
    %c0_27 = arith.constant 0 : index
    %72 = vector.load %arg7[%c0_26, %c0_27] : memref<64x16xf32, #tpu.memory_space<vmem>>, vector<64x16xf32>
    %cst_28 = arith.constant dense<0.000000e+00> : vector<64x256xf32>
    %73 = tpu.matmul %72, %71, %cst_28 {dimension_numbers = #tpu.dot_dimension_numbers<[1], [0], [0], [1], [0, 0, 1, 1], [], []>} : vector<64x16xf32>, vector<16x256xf32>, vector<64x256xf32> -> vector<64x256xf32>
    %c0_29 = arith.constant 0 : index
    %c0_30 = arith.constant 0 : index
    %74 = vector.load %arg8[%c0_29, %c0_30] : memref<64x1xf32, #tpu.memory_space<vmem>>, vector<64x1xf32>
    %75 = vector.broadcast %74 : vector<64x1xf32> to vector<64x256xf32>
    %76 = arith.addf %73, %75 : vector<64x256xf32>
    %77 = arith.addf %76, %1 : vector<64x256xf32>
    %cst_31 = arith.constant 0.000000e+00 : f32
    %78 = vector.broadcast %cst_31 : f32 to vector<64x256xf32>
    %79 = arith.maximumf %77, %78 : vector<64x256xf32>
    %c0_32 = arith.constant 0 : index
    %c0_33 = arith.constant 0 : index
    %c0_34 = arith.constant 0 : index
    %80 = vector.load %arg9[%c0_32, %c0_33, %c0_34] : memref<1x64x256xf32, #tpu.memory_space<vmem>>, vector<1x64x256xf32>
    %81 = vector.shape_cast %80 : vector<1x64x256xf32> to vector<64x256xf32>
    %82 = vector.shape_cast %79 : vector<64x256xf32> to vector<1x64x256xf32>
    tpu.vector_store %arg9[%c0_32, %c0_33, %c0_34], %82 {strides = array<i32>} : memref<1x64x256xf32, #tpu.memory_space<vmem>>, vector<1x64x256xf32>,
    return
  }
  func.func @transform_0(%arg0: i32) -> (i32, i32, i32) {
    %c0_i32 = arith.constant 0 : i32
    %c0_i32_0 = arith.constant 0 : i32
    %c0_i32_1 = arith.constant 0 : i32
    return %arg0, %c0_i32, %c0_i32_0 : i32, i32, i32
  }
  func.func @transform_1(%arg0: i32) -> (i32, i32) {
    %c0_i32 = arith.constant 0 : i32
    %c0_i32_0 = arith.constant 0 : i32
    %c0_i32_1 = arith.constant 0 : i32
    return %c0_i32, %c0_i32_0 : i32, i32
  }
  func.func @transform_2(%arg0: i32) -> (i32, i32) {
    %c0_i32 = arith.constant 0 : i32
    %c0_i32_0 = arith.constant 0 : i32
    %c0_i32_1 = arith.constant 0 : i32
    return %c0_i32, %c0_i32_0 : i32, i32
  }
  func.func @transform_3(%arg0: i32) -> (i32, i32) {
    %c0_i32 = arith.constant 0 : i32
    %c0_i32_0 = arith.constant 0 : i32
    %c0_i32_1 = arith.constant 0 : i32
    return %c0_i32, %c0_i32_0 : i32, i32
  }
  func.func @transform_4(%arg0: i32) -> (i32, i32) {
    %c0_i32 = arith.constant 0 : i32
    %c0_i32_0 = arith.constant 0 : i32
    %c0_i32_1 = arith.constant 0 : i32
    return %c0_i32, %c0_i32_0 : i32, i32
  }
  func.func @transform_5(%arg0: i32) -> (i32, i32) {
    %c0_i32 = arith.constant 0 : i32
    %c0_i32_0 = arith.constant 0 : i32
    %c0_i32_1 = arith.constant 0 : i32
    return %c0_i32, %c0_i32_0 : i32, i32
  }
  func.func @transform_6(%arg0: i32) -> (i32, i32) {
    %c0_i32 = arith.constant 0 : i32
    %c0_i32_0 = arith.constant 0 : i32
    %c0_i32_1 = arith.constant 0 : i32
    return %c0_i32, %c0_i32_0 : i32, i32
  }
  func.func @transform_7(%arg0: i32) -> (i32, i32) {
    %c0_i32 = arith.constant 0 : i32
    %c0_i32_0 = arith.constant 0 : i32
    %c0_i32_1 = arith.constant 0 : i32
    return %c0_i32, %c0_i32_0 : i32, i32
  }
  func.func @transform_8(%arg0: i32) -> (i32, i32, i32) {
    %c0_i32 = arith.constant 0 : i32
    %c0_i32_0 = arith.constant 0 : i32
    %c0_i32_1 = arith.constant 0 : i32
    return %arg0, %c0_i32, %c0_i32_0 : i32, i32, i32
  }
}

</mosaic_0001>

<bundles_post_ra>
// kernel: tpu_custom_call.1
= control target key start
LH: loop header
LB: loop body
LE: loop exit
PB: predicated region body
PF: predicated region fallthrough
CT: control target
= control target key end

     0   :  { %13 = vsyncpa [#allocation3], 0  ;;  %s2080_s0 = inlined_call_operand.hbm [shape: f32[8,64,256], index: 0, kind: input, shape index: {}]   ;;  %s2081_s1 = inlined_call_operand.vmem [shape: s32[2,256], index: 1, kind: input, shape index: {}]   ;;  %s2082_s2 = inlined_call_operand.vmem [shape: f32[16,64], index: 2, kind: input, shape index: {}]   ;;  %s2083_s3 = inlined_call_operand.vmem [shape: f32[16,1], index: 3, kind: input, shape index: {}]   ;;  %s2084_s4 = inlined_call_operand.vmem [shape: f32[16,144], index: 4, kind: input, shape index: {}]   ;;  %s2085_s5 = inlined_call_operand.vmem [shape: f32[16,1], index: 5, kind: input, shape index: {}]   ;;  %s2086_s6 = inlined_call_operand.vmem [shape: f32[64,16], index: 6, kind: input, shape index: {}]   ;;  %s2087_s7 = inlined_call_operand.vmem [shape: f32[64,1], index: 7, kind: input, shape index: {}]   ;;  %s2088_s8 = inlined_call_operand.hbm [shape: f32[8,64,256], index: 8, kind: output, shape index: {}]  }
   0x1   :  { %15 = vsyncpa [#allocation3 + $0x1], 0 }
   0x2   :  { %16 = vsyncpa [#allocation4], 0 }
   0x3   :  { %18 = vsyncpa [#allocation4 + $0x1], 0  ;;  %s1456_s27 = smov 0   ;;  %s1458_s28 = smov 0  }
   0x4   :  { %s1460_s29 = smov 0   ;;  %s1462_s30 = smov 0  }
   0x5 LB: > { %s1477_s9 = sadd.s32 4294967295, %s1394_s30   ;;  %s1175_s10 = sadd.s32 4294967294, %s1394_s30   ;;  %s1394_s30 = sphi %s1462_s30, %s2112_s30   ;;  %s1390_s29 = sphi %s1460_s29, %s2111_s29   ;;  %s1386_s28 = sphi %s1458_s28, %s2110_s28   ;;  %s1382_s27 = sphi %s1456_s27, %s2109_s27  }
   0x6   : > { %s1481_s11 = sadd.s32 1, %s1394_s30   ;;  %s31_s12 = sadd.s32 1, %s1390_s29 }
   0x7   : > { %s28_s13 = ssub.s32 %s1394_s30, %s1481_s11  ;;  %p38_p0 = scmp.ne.s32.totalorder %s1390_s29, %s1386_s28 }
   0x8   : > { %p29_p1 = scmp.eq.s32.totalorder %s28_s13, 0  ;;  %p39_p2 = scmp.eq.s32.totalorder %s1394_s30, 0 }
   0x9   : > { %p44_p3 = scmp.ne.s32.totalorder %s1386_s28, %s1382_s27  ;;  %p45_p4 = scmp.eq.s32.totalorder %s1477_s9, 0 }
   0xa   : > { %s1493_s14 = scalar_select %p29_p1, %s1390_s29, %s31_s12  }
   0xb   : > { %p1495_p5 = por %p39_p2, %p38_p0  ;;  %p1499_p6 = por %p45_p4, %p44_p3 }
   0xc   : > { %2091 = sst [smem:[#allocation8_spill]] %s1493_s14  ;;  %p215_p7 = scmp.eq.s32.totalorder %s1477_s9, 7 }
   0xd   : > { %s2093_s16 = scalar_select %p1499_p6, 1, 0 }
   0xe   : > { %p221_p8 = scmp.eq.s32.totalorder %s1175_s10, 7  ;;  %p1253_p9 = scmp.lt.s32.totalorder %s1394_s30, 8 }
   0xf   : > { %p1505_p10 = por %p215_p7, %p38_p0  ;;  %s262_s19 = sand.u32 1, %s1390_s29  }
  0x10   : > { %p1509_p11 = por %p221_p8, %p44_p3  ;;  %s1235_s20 = sshll.u32 %s1394_s30, 11 }
  0x11   : > { %s2094_s17 = scalar_select %p1505_p10, 1, 0 }
  0x12   : > { %s2095_s18 = scalar_select %p1509_p11, 1, 0 }
  0x13   : > { %s1178_s21 = sshll.u32 %s262_s19, 7  ;;  %s1518_s24 = scalar_lea.hbm %s2080_s0, %s1235_s20 }
  0x14   : > { %s266_s25 = scalar_lea.vmem [#allocation2], %s1178_s21  ;;  %p1522_p12 = pnand %p1253_p9, %p1495_p5 }
  0x15   : > { %s273_s26 = sshll.u32 %s266_s25, 4  ;;  %s1528_s12 = scalar_lea.sflag [#allocation3], %s262_s19  ;;  %s1526_s26 = int_to_ptr.vmem [resolvable:$true] %s273_s26 }
  0x16   : > { %s1302_s13 = scalar_lea.hbm %s1518_s24, 2048  ;;  %p1304_p0 = pneg %p1522_p12 }
  0x17   : > { %p1303_p13 = scmp.ne.s32.totalorder %s1518_s24, %s1302_s13  ;;  %s1307_s21 = scalar_lea.hbm %s2080_s0, 16384 }
  0x18   : > { %p1308_p3 = scmp.lt.s32.totalorder %s1518_s24, %s2080_s0  ;;  %p1309_p4 = scmp.lt.s32.totalorder %s1307_s21, %s1302_s13 }
  0x19   : > { %p1305_p1 = pnand %p1304_p0, %p1303_p13 }
  0x1a   : > { %p1310_p5 = por %p1309_p4, %p1308_p3 }
  0x1b   : > { %p1306_p2 = pneg %p1305_p1 }
  0x1d   : > { %p1311_p7 = pnand %p1310_p5, %p1306_p2 }
  0x1f   : > { %1314 = shalt.err (!%p1311_p7)
}
  0x20   : > { %s1315_s19 = scalar_lea.vmem %s1526_s26, 2048  ;;  %s1396_s25 = smov [#allocation2]  }
  0x21   : > { %p1316_p8 = scmp.ne.s32.totalorder %s1526_s26, %s1315_s19  ;;  %s1320_s14 = sshll.u32 %s1396_s25, 4  ;;  %s1321_s14 = int_to_ptr.vmem [resolvable:$false] %s1320_s14 }
  0x22   : > { %s1322_s20 = scalar_lea.vmem %s1321_s14, 4096  ;;  %p1323_p1 = scmp.lt.s32.totalorder %s1526_s26, %s1321_s14 }
  0x23   : > { %p1318_p9 = pnand %p1316_p8, %p1304_p0  ;;  %p1324_p11 = scmp.lt.s32.totalorder %s1322_s20, %s1315_s19 }
  0x25   : > { %p1319_p13 = pneg %p1318_p9  ;;  %p1325_p10 = por %p1324_p11, %p1323_p1 }
  0x27   : > { %p1326_p6 = pnand %p1325_p10, %p1319_p13 }
  0x29   : > { %1329 = shalt.err (!%p1326_p6)
}
  0x2a   : > { %s1397_s13 = smov 256   ;;  %s1398_s22 = smov 16  }
  0x2b   : > { %1248 = dma.hbm_to_vmem [thread:$0]  (!%p1522_p12), %s1518_s24, 2048, %s1526_s26, %s1528_s12, %s1397_s13, %s1397_s13, %s1398_s22  }
  0x2c   : > { %p1181_p0 = scmp.ge.s32.totalorder %s1394_s30, 1  ;;  %p281_p2 = scmp.lt.s32.totalorder %s1394_s30, 9 }
  0x2e   : > { %p282_p3 = pnand %p1181_p0, %p281_p2 }
  0x2f   : > { %s1552_s14 = sand.u32 (!%p282_p3), 1, %s1386_s28   ;;  %p2097_p6 = scmp.ne.s32.totalorder (!%p282_p3), %s2093_s16, 0 }
  0x30   : > { %285 = sbr.rel (%p282_p3) target bundleno = 899 (0x383), region = 52  ;;  %s1182_s21 = sshll.u32 (!%p282_p3), %s1552_s14, 7 }
  0x31   : > { %s288_s15 = scalar_lea.sflag (!%p282_p3), [#allocation3], %s1552_s14  ;;  %s1558_s23 = scalar_lea.vmem (!%p282_p3), [#allocation2], %s1182_s21 }
  0x35   : > { %1373 = dma.done.wait (%p2097_p6), %s288_s15, 2048  }
  0x36   : > { %1375 = vsyncadd (%p2097_p6), %s288_s15, 4294965248  ;;  %v1399_v0 = vmov 0.0   ;;  %v1400_v1 = vmov 0   ;;  %v1568_v2 = vld [vmem:[%s1558_s23 + $0x78] sm:$0xff]  ;;  %v1571_v3 = vld [vmem:[%s1558_s23 + $0x70] sm:$0xff]  ;;  %vm354_vm0 = vcmask 523264   ;;  %v453_v55 = vlaneseq }
  0x37   : > { %425 = vmatprep.mubr.f32.mxu0 %v1399_v0  ;;  %1300 = vset.pattern.permute.xlu0 %v1400_v1  ;;  %v1574_v4 = vld [vmem:[%s1558_s23 + $0x68] sm:$0xff]  ;;  %v1578_v5 = vld [vmem:[%s1558_s23 + $0x60] sm:$0xff]  ;;  %v1582_v6 = vld [vmem:[%s1558_s23 + $0x58] sm:$0xff]  ;;  %s1401_s13 = smov 112   ;;  %s1402_s22 = smov 113   ;;  %vm759_vm1 = vcmask 130048  }
  0x38   : > { %1301 = vset.pattern.permute.xlu1 %v1400_v1  ;;  %377 = vmatprep.subr.mxu0 %v1568_v2  ;;  %v1586_v7 = vld [vmem:[%s1558_s23 + $0x50] sm:$0xff]  ;;  %v1590_v8 = vld [vmem:[%s1558_s23 + $0x48] sm:$0xff]  ;;  %v1594_v9 = vld [vmem:[%s1558_s23 + $0x40] sm:$0xff]  ;;  %s1403_s15 = smov 127   ;;  %s1405_s16 = smov 15   ;;  %v467_v58 = vshrl.u32 %v453_v55, 7 }
  0x39   : > { %378 = vmatpush1.msra.mxu0 %v1571_v3  ;;  %v1598_v10 = vld [vmem:[%s1558_s23 + $0x38] sm:$0xff]  ;;  %v343_v11 = vld [vmem:[%s2083_s3 + $0x8] sm:$0xff]  ;;  %v1605_v12 = vld [vmem:[%s1558_s23 + $0x30] sm:$0xff]  ;;  %s1406_s24 = smov 16   ;;  %s1407_s26 = smov 17  }
  0x3a   : > { %379 = vmatprep.subr.mxu0 %v1574_v4  ;;  %351 = vperm.xlu0 %1300, %v343_v11   ;;  %v1609_v13 = vld [vmem:[%s1558_s23 + $0x28] sm:$0xff]  ;;  %v342_v14 = vld [vmem:[%s2083_s3] sm:$0xff]  ;;  %v1620_v16 = vld [vmem:[%s1558_s23 + $0x18] sm:$0xff]  ;;  %s1408_s10 = smov 111   ;;  %v1754_v62 = vsub.s32 2, %v467_v58  ;;  %v1758_v11 = vsub.s32 0, %v467_v58 }
  0x3b   : > { %380 = vmatpush1.msra.mxu0 %v1578_v5  ;;  %v1616_v15 = vld [vmem:[%s1558_s23 + $0x20] sm:$0xff]  ;;  %v1624_v17 = vld [vmem:[%s1558_s23 + $0x10] sm:$0xff]  ;;  %v1628_v18 = vld [vmem:[%s1558_s23 + $0x8] sm:$0xff]  ;;  %s1998_s20 = scalar_lea.vmem [#allocation5], %s1182_s21  ;;  %s1236_s21 = sshll.u32 %s1477_s9, 11 }
  0x3c   : > { %381 = vmatprep.subr.mxu0 %v1582_v6  ;;  %v1632_v19 = vld [vmem:[%s1558_s23] sm:$0xff]  ;;  %v341_v21 = vld [vmem:[%s2082_s2 + $0x8] sm:$0xff]  ;;  %s1404_s23 = smov 1   ;;  %v857_v39 = vld [vmem:[%s2087_s7 + $0x10] sm:$0xff]  ;;  %p2106_p11 = scmp.ne.s32.totalorder %s2094_s17, 0 }
  0x3d   : > { %382 = vmatpush1.msra.mxu0 %v1586_v7  ;;  %v340_v20 = vld [vmem:[%s2082_s2] sm:$0xff]  ;;  %v744_v36 = vld [vmem:[%s2084_s4 + $0x8] sm:$0xff]  ;;  %v861_v42 = vld [vmem:[%s2087_s7 + $0x30] sm:$0xff] }
  0x3e   : > { %383 = vmatprep.subr.mxu0 %v1590_v8  ;;  %346 = vperm.xlu0 %1300, %v342_v14   ;;  %v748_v37 = vld [vmem:[%s2085_s5 + $0x8] sm:$0xff]  ;;  %v855_v38 = vld [vmem:[%s2087_s7] sm:$0xff]  ;;  %v858_v44 = vld [vmem:[%s2087_s7 + $0x18] sm:$0xff] }
  0x3f   : > { %384 = vmatpush1.msra.mxu0 %v1594_v9  ;;  %1220 = vmatprep.mubr.msk.f32.mxu1 %vm759_vm1, %v744_v36  ;;  %v859_v40 = vld [vmem:[%s2087_s7 + $0x20] sm:$0xff]  ;;  %v856_v43 = vld [vmem:[%s2087_s7 + $0x8] sm:$0xff]  ;;  %v862_v46 = vld [vmem:[%s2087_s7 + $0x38] sm:$0xff] }
  0x40   : > { %385 = vmatprep.subr.mxu0 %v1598_v10  ;;  %v747_v41 = vld [vmem:[%s2085_s5] sm:$0xff]  ;;  %v860_v45 = vld [vmem:[%s2087_s7 + $0x28] sm:$0xff] }
  0x41   : > { %386 = vmatpush1.msra.mxu0 %v1605_v12  ;;  %v1726_v49 = vld [vmem:[%s2081_s1] sm:$0xf] }
  0x42   : > { %387 = vmatprep.subr.mxu0 %v1609_v13  ;;  %vm443_vm2 = vcmp.ge.s32.totalorder %v1726_v49, 1  ;;  %vm444_vm3 = vcmp.le.s32.totalorder %v1726_v49, 14 }
  0x43   : > { %388 = vmatpush1.msra.mxu0 %v1616_v15  ;;  %v1738_v53 = vsel %vm443_vm2, 1, %v1400_v1  ;;  %v536_v14 = vsel %vm444_vm3, 1, %v1400_v1 }
  0x44   : > { %389 = vmatprep.subr.mxu0 %v1620_v16  ;;  %v1186_v57 = vrot.slane %v1738_v53, 9 }
  0x45   : > { %390 = vmatpush1.msra.mxu0 %v1624_v17 }
  0x46   : > { %391 = vmatprep.subr.mxu0 %v1628_v18  ;;  %vm1750_vm4 = vcmp.ne.s32.totalorder %v1186_v57, 0 }
  0x47   : > { %392 = vmatpush1.msra.mxu0 %v1632_v19  ;;  %vm647_vm5 = vmand %vm444_vm3, %vm1750_vm4 }
  0x48   : > { %1184 = vmatmul.mubr.msk.f32.vlgmr.msra.gmra.mxu0 %vm354_vm0, %v340_v20 }
  0x49   : > { %431 = vmatprep.mubr.f32.mxu0 %v1399_v0 }
  0x4c   : > { %1185 = vmatmul.mubr.msk.f32.gmra.mxu0 %vm354_vm0, %v341_v21  ;;  %v691_v21 = vrot.slane %v536_v14, %v1754_v62 }
  0x4d   : > { %991 = vmatprep.mubr.f32.mxu0 %v1399_v0 }
  0xb5   : > { %v352_v22 = vpop.permute.xlu0 %351 }
  0xb9   : > { %v347_v23 = vpop.permute.xlu0 %346 }
 0x108   : > { %v427_v24 = vpop.f32.mrf.mxu0 }
 0x109   : > { %v428_v25 = vadd.f32 %v427_v24, %v347_v23  ;;  %v648_v24 = vsel %vm647_vm5, 1, %v1400_v1  ;;  %vm464_vm5 = vmand %vm443_vm2, %vm1750_vm4 }
 0x10a   : > { %v429_v26 = vpop.f32.mrf.mxu0  ;;  %v652_v36 = vrot.slane %v648_v24, %v1758_v11 }
 0x10b   : > { %v1645_v27 = vmax.f32 %v428_v25, 0.0  ;;  %v430_v28 = vadd.f32 %v429_v26, %v347_v23  ;;  %v687_v23 = vrot.slane %v536_v14, %v1758_v11  ;;  %v699_v26 = vrot.slane %v691_v21, %v1758_v11 }
 0x10c   : > { %v433_v30 = vpop.f32.mrf.mxu0 }
 0x10d   : > { %v1647_v29 = vmax.f32 %v430_v28, 0.0  ;;  %671 = vrot.lane.b32.xlu0 %v1645_v27, %s1401_s13  ;;  %v434_v31 = vadd.f32 %v433_v30, %v352_v22  ;;  %v656_v28 = vrot.slane %v648_v24, %v1754_v62  ;;  %v583_v30 = vsub.s32 3, %v467_v58 }
 0x10e   : > { %v435_v32 = vpop.f32.mrf.mxu0  ;;  %vm701_vm6 = vcmp.eq.s32.totalorder %v699_v26, 1 }
 0x10f   : > { %675 = vrot.lane.b32.xlu1 %v1647_v29, %s1401_s13  ;;  %v1661_v33 = vmax.f32 %v434_v31, 0.0  ;;  %v436_v34 = vadd.f32 %v435_v32, %v352_v22  ;;  %v1776_v31 = vand.u32 127, %v453_v55 }
 0x111   : > { %634 = vrot.lane.b32.xlu0 %v1645_v27, %s1402_s22  ;;  %v1667_v35 = vmax.f32 %v436_v34, 0.0  ;;  %v695_v34 = vrot.slane %v687_v23, %v1758_v11  ;;  %vm679_vm7 = vcmp.lt.s32.totalorder %v1776_v31, 112  ;;  %vm642_vm11 = vcmp.lt.s32.totalorder %v1776_v31, 113 }
 0x112   : > { %vm607_vm15 = vcmp.lt.s32.totalorder %v1776_v31, 127 }
 0x113   : > { %638 = vrot.lane.b32.xlu1 %v1647_v29, %s1402_s22  ;;  %vm700_vm8 = vcmp.eq.s32.totalorder %v695_v34, 1 }
 0x115   : > { %599 = vrot.lane.b32.xlu0 %v1645_v27, %s1403_s15 }
 0x117   : > { %603 = vrot.lane.b32.xlu1 %v1647_v29, %s1403_s15 }
 0x119   : > { %564 = vrot.lane.b32.xlu0 %v1645_v27, %s1404_s23 }
 0x11b   : > { %568 = vrot.lane.b32.xlu1 %v1647_v29, %s1404_s23 }
 0x11d   : > { %523 = vrot.lane.b32.xlu0 %v1645_v27, %s1405_s16 }
 0x11f   : > { %527 = vrot.lane.b32.xlu1 %v1647_v29, %s1405_s16 }
 0x121   : > { %488 = vrot.lane.b32.xlu0 %v1645_v27, %s1406_s24 }
 0x123   : > { %492 = vrot.lane.b32.xlu1 %v1647_v29, %s1406_s24 }
 0x125   : > { %636 = vrot.lane.b32.xlu0 %v1661_v33, %s1402_s22 }
 0x127   : > { %673 = vrot.lane.b32.xlu1 %v1661_v33, %s1401_s13 }
 0x129   : > { %601 = vrot.lane.b32.xlu0 %v1661_v33, %s1403_s15 }
 0x12b   : > { %677 = vrot.lane.b32.xlu1 %v1667_v35, %s1401_s13  ;;  %s1102_s13 = sshll.u32 %s1998_s20, 4  ;;  %s2036_s13 = int_to_ptr.vmem [resolvable:$true] %s1102_s13 }
 0x12c   : > { %s1330_s9 = scalar_lea.vmem %s2036_s13, 2048 }
 0x12d   : > { %445 = vrot.lane.b32.xlu0 %v1645_v27, %s1407_s26  ;;  %p1331_p10 = scmp.ne.s32.totalorder %s2036_s13, %s1330_s9 }
 0x12f   : > { %640 = vrot.lane.b32.xlu1 %v1667_v35, %s1402_s22  ;;  %p1332_p12 = pnand %p1331_p10, %p2106_p11 }
 0x131   : > { %566 = vrot.lane.b32.xlu0 %v1661_v33, %s1404_s23  ;;  %p1333_p4 = pneg %p1332_p12 }
 0x133   : > { %605 = vrot.lane.b32.xlu1 %v1667_v35, %s1403_s15  ;;  %s2033_s15 = scalar_lea.hbm %s2088_s8, %s1236_s21 }
 0x135   : > { %525 = vrot.lane.b32.xlu0 %v1661_v33, %s1405_s16 }
 0x137   : > { %449 = vrot.lane.b32.xlu1 %v1647_v29, %s1407_s26 }
 0x139   : > { %490 = vrot.lane.b32.xlu0 %v1661_v33, %s1406_s24 }
 0x13b   : > { %570 = vrot.lane.b32.xlu1 %v1667_v35, %s1404_s23  ;;  %s1089_s23 = scalar_lea.sflag [#allocation4], %s1552_s14 }
 0x13d   : > { %447 = vrot.lane.b32.xlu0 %v1661_v33, %s1407_s26 }
 0x13f   : > { %529 = vrot.lane.b32.xlu1 %v1667_v35, %s1405_s16  ;;  %s1409_s16 = smov [#allocation5]  }
 0x140   : > { %s1334_s12 = sshll.u32 %s1409_s16, 4  ;;  %s1335_s12 = int_to_ptr.vmem [resolvable:$false] %s1334_s12 }
 0x141   : > { %708 = vrot.lane.b32.xlu0 %v1661_v33, %s1408_s10  ;;  %p1337_p5 = scmp.lt.s32.totalorder %s2036_s13, %s1335_s12 }
 0x143   : > { %494 = vrot.lane.b32.xlu1 %v1667_v35, %s1406_s24 }
 0x145   : > { %706 = vrot.lane.b32.xlu0 %v1645_v27, %s1408_s10 }
 0x147   : > { %451 = vrot.lane.b32.xlu1 %v1667_v35, %s1407_s26  ;;  %s1336_s26 = scalar_lea.vmem %s1335_s12, 4096 }
 0x148   : > { %p1338_p7 = scmp.lt.s32.totalorder %s1336_s26, %s1330_s9 }
 0x149   : > { %756 = vperm.xlu0 %1300, %v748_v37   ;;  %v579_v37 = vsub.s32 1, %v467_v58 }
 0x14a   : > { %p1339_p8 = por %p1338_p7, %p1337_p5 }
 0x14b   : > { %712 = vrot.lane.b32.xlu1 %v1667_v35, %s1408_s10 }
 0x14c   : > { %p1340_p9 = pnand %p1339_p8, %p1333_p4 }
 0x14d   : > { %865 = vperm.xlu0 %1300, %v855_v38   ;;  %v1187_v38 = vrot.slane %v536_v14, 9 }
 0x14f   : > { %710 = vrot.lane.b32.xlu1 %v1647_v29, %s1408_s10  ;;  %vm1783_vm9 = vcmp.ne.s32.totalorder %v1187_v38, 0 }
 0x150   : > { %vm540_vm13 = vmand %vm443_vm2, %vm1783_vm9 }
 0x151   : > { %875 = vperm.xlu0 %1300, %v857_v39   ;;  %vm719_vm4 = vmand %vm444_vm3, %vm1783_vm9  ;;  %vm496_vm3 = vcmp.lt.s32.totalorder %v1776_v31, 16 }
 0x153   : > { %751 = vperm.xlu1 %1301, %v747_v41   ;;  %v619_v41 = vrot.slane %v536_v14, %v583_v30 }
 0x155   : > { %885 = vperm.xlu0 %1300, %v859_v40   ;;  %v664_v40 = vrot.slane %v656_v28, %v1758_v11  ;;  %v627_v21 = vrot.slane %v619_v41, %v579_v37  ;;  %v580_v41 = vrot.slane %v1738_v53, %v579_v37 }
 0x157   : > { %870 = vperm.xlu1 %1301, %v856_v43   ;;  %v660_v43 = vrot.slane %v652_v36, %v1758_v11  ;;  %vm666_vm10 = vcmp.eq.s32.totalorder %v664_v40, 1  ;;  %vm1808_vm14 = vcmp.eq.s32.totalorder %v627_v21, 1  ;;  %v584_v36 = vrot.slane %v1738_v53, %v583_v30 }
 0x159   : > { %895 = vperm.xlu0 %1300, %v861_v42   ;;  %vm665_vm12 = vcmp.eq.s32.totalorder %v660_v43, 1  ;;  %v588_v43 = vrot.slane %v580_v41, %v579_v37 }
 0x15b   : > { %880 = vperm.xlu1 %1301, %v858_v44   ;;  %v615_v44 = vrot.slane %v536_v14, %v579_v37  ;;  %vm593_vm2 = vcmp.eq.s32.totalorder %v588_v43, 1 }
 0x15d   : > { %v623_v14 = vrot.slane %v615_v44, %v579_v37 }
 0x15f   : > { %890 = vperm.xlu1 %1301, %v860_v45   ;;  %vm628_vm0 = vcmp.eq.s32.totalorder %v623_v14, 1 }
 0x163   : > { %900 = vperm.xlu1 %1301, %v862_v46  }
 0x17f   : > { %v672_v47 = vpop.permute.xlu0 %671 }
 0x181   : > { %v676_v48 = vpop.permute.xlu1 %675 }
 0x182   : > { %v682_v58 = vsel %vm679_vm7, %v676_v48, %v672_v47  ;;  %v680_v23 = vsel %vm679_vm7, %v672_v47, %v676_v48 }
 0x183   : > { %v1728_v50 = vpop.permute.xlu0 %634 }
 0x185   : > { %v1730_v51 = vpop.permute.xlu1 %638 }
 0x186   : > { %v645_v48 = vsel %vm642_vm11, %v1730_v51, %v1728_v50  ;;  %v643_v34 = vsel %vm642_vm11, %v1728_v50, %v1730_v51  ;;  %v592_v51 = vrot.slane %v584_v36, %v579_v37  ;;  %v508_v37 = vrot.slane %v1738_v53, %v1754_v62 }
 0x187   : > { %v1733_v52 = vpop.permute.xlu0 %599 }
 0x189   : > { %v1740_v54 = vpop.permute.xlu1 %603 }
 0x18a   : > { %v610_v50 = vsel %vm607_vm15, %v1740_v54, %v1733_v52 }
 0x18b   : > { %v1742_v56 = vpop.permute.xlu0 %564 }
 0x18d   : > { %v1745_v59 = vpop.permute.xlu1 %568 }
 0x18f   : > { %v1748_v60 = vpop.permute.xlu0 %523 }
 0x191   : > { %v1756_v63 = vpop.permute.xlu1 %527 }
 0x193   : > { %v1767_v20 = vpop.permute.xlu0 %488 }
 0x195   : > { %v1770_v22 = vpop.permute.xlu1 %492 }
 0x197   : > { %v637_v25 = vpop.permute.xlu0 %636 }
 0x199   : > { %v674_v32 = vpop.permute.xlu1 %673 }
 0x19b   : > { %v602_v39 = vpop.permute.xlu0 %601 }
 0x19d   : > { %v678_v42 = vpop.permute.xlu1 %677 }
 0x19e   : > { %v683_v45 = vsel %vm679_vm7, %v678_v42, %v674_v32  ;;  %v681_v46 = vsel %vm679_vm7, %v674_v32, %v678_v42  ;;  %vm572_vm7 = vcmp.lt.s32.totalorder %v1776_v31, 1 }
 0x19f   : > { %1188 = vmatprep.subr.msk.mxu1 %vm701_vm6, %v683_v45  ;;  %v1788_v57 = vpop.permute.xlu0 %445  ;;  %v608_v45 = vsel %vm607_vm15, %v1733_v52, %v1740_v54  ;;  %v575_v55 = vsel %vm572_vm7, %v1745_v59, %v1742_v56 }
 0x1a0   : > { %1189 = vmatpush1.msk.msra.mxu1 %vm700_vm8, %v681_v46 }
 0x1a1   : > { %v641_v24 = vpop.permute.xlu1 %640  ;;  %1190 = vmatprep.subr.msk.mxu1 %vm701_vm6, %v682_v58  ;;  %vm1843_vm6 = vcmp.eq.s32.totalorder %v592_v51, 1 }
 0x1a2   : > { %v644_v28 = vsel %vm642_vm11, %v637_v25, %v641_v24  ;;  %v646_v32 = vsel %vm642_vm11, %v641_v24, %v637_v25  ;;  %1191 = vmatpush1.msk.msra.mxu1 %vm700_vm8, %v680_v23  ;;  %v541_v25 = vsel %vm540_vm13, 1, %v1400_v1  ;;  %vm531_vm8 = vcmp.lt.s32.totalorder %v1776_v31, 15 }
 0x1a3   : > { %1192 = vmatprep.subr.msk.mxu1 %vm666_vm10, %v646_v32  ;;  %v567_v47 = vpop.permute.xlu0 %566  ;;  %v549_v30 = vrot.slane %v541_v25, %v1754_v62  ;;  %v545_v40 = vrot.slane %v541_v25, %v1758_v11  ;;  %v720_v32 = vsel %vm719_vm4, 1, %v1400_v1  ;;  %v534_v26 = vsel %vm531_vm8, %v1756_v63, %v1748_v60 }
 0x1a4   : > { %1193 = vmatpush1.msk.msra.mxu1 %vm665_vm12, %v644_v28 }
 0x1a5   : > { %v606_v38 = vpop.permute.xlu1 %605  ;;  %1194 = vmatprep.subr.msk.mxu1 %vm666_vm10, %v645_v48  ;;  %v557_v58 = vrot.slane %v549_v30, %v1758_v11  ;;  %v553_v54 = vrot.slane %v545_v40, %v1758_v11 }
 0x1a6   : > { %v609_v42 = vsel %vm607_vm15, %v602_v39, %v606_v38  ;;  %v611_v44 = vsel %vm607_vm15, %v606_v38, %v602_v39  ;;  %1195 = vmatpush1.msk.msra.mxu1 %vm665_vm12, %v643_v34  ;;  %v724_v38 = vrot.slane %v720_v32, %v1758_v11 }
 0x1a7   : > { %1196 = vmatprep.subr.msk.mxu1 %vm1808_vm14, %v611_v44  ;;  %v526_v46 = vpop.permute.xlu0 %525  ;;  %vm559_vm10 = vcmp.eq.s32.totalorder %v557_v58, 1  ;;  %vm558_vm11 = vcmp.eq.s32.totalorder %v553_v54, 1  ;;  %v746_v54 = vld [vmem:[%s2084_s4 + $0x18] sm:$0xff] }
 0x1a8   : > { %1197 = vmatpush1.msk.msra.mxu1 %vm628_vm0, %v609_v42  ;;  %v499_v42 = vsel %vm496_vm3, %v1770_v22, %v1767_v20  ;;  %v732_v30 = vrot.slane %v724_v38, %v1758_v11 }
 0x1a9   : > { %v1831_v39 = vpop.permute.xlu1 %449  ;;  %1198 = vmatprep.subr.msk.mxu1 %vm1808_vm14, %v610_v50  ;;  %vm455_vm14 = vcmp.lt.s32.totalorder %v1776_v31, 17 }
 0x1aa   : > { %1199 = vmatpush1.msk.msra.mxu1 %vm628_vm0, %v608_v45  ;;  %vm714_vm0 = vcmp.lt.s32.totalorder %v1776_v31, 111 }
 0x1ab   : > { %778 = vmatprep.subr.mxu1 %v1667_v35  ;;  %v504_v35 = vrot.slane %v1738_v53, %v1758_v11  ;;  %v573_v53 = vsel %vm572_vm7, %v1742_v56, %v1745_v59  ;;  %v532_v56 = vsel %vm531_vm8, %v1748_v60, %v1756_v63  ;;  %v728_v59 = vrot.slane %v720_v32, %v1754_v62  ;;  %v847_v32 = vld [vmem:[%s2086_s6] sm:$0xff] }
 0x1ac   : > { %779 = vmatpush1.msra.mxu1 %v1661_v33  ;;  %v465_v33 = vsel %vm464_vm5, 1, %v1400_v1  ;;  %v497_v60 = vsel %vm496_vm3, %v1767_v20, %v1770_v22  ;;  %v456_v20 = vsel %vm455_vm14, %v1788_v57, %v1831_v39  ;;  %v458_v22 = vsel %vm455_vm14, %v1831_v39, %v1788_v57  ;;  %v743_v39 = vld [vmem:[%s2084_s4] sm:$0xff] }
 0x1ad   : > { %v571_v61 = vpop.permute.xlu1 %570  ;;  %780 = vmatprep.subr.mxu1 %v1647_v29  ;;  %v491_v29 = vpop.permute.xlu0 %490  ;;  %v473_v49 = vrot.slane %v465_v33, %v1754_v62  ;;  %v512_v14 = vrot.slane %v504_v35, %v1758_v11  ;;  %v469_v28 = vrot.slane %v465_v33, %v1758_v11  ;;  %v736_v63 = vrot.slane %v728_v59, %v1758_v11  ;;  %v851_v59 = vld [vmem:[%s2086_s6 + $0x20] sm:$0xff] }
 0x1ae   : > { %v574_v21 = vsel %vm572_vm7, %v567_v47, %v571_v61  ;;  %v576_v23 = vsel %vm572_vm7, %v571_v61, %v567_v47  ;;  %781 = vmatpush1.msra.mxu1 %v1645_v27  ;;  %v516_v27 = vrot.slane %v508_v37, %v1758_v11  ;;  %v745_v37 = vld [vmem:[%s2084_s4 + $0x10] sm:$0xff] }
 0x1af   : > { %1200 = vmatprep.subr.msk.mxu1 %vm1843_vm6, %v574_v21  ;;  %v481_v1 = vrot.slane %v473_v49, %v1758_v11  ;;  %vm517_vm12 = vcmp.eq.s32.totalorder %v512_v14, 1  ;;  %v477_v34 = vrot.slane %v469_v28, %v1758_v11  ;;  %vm738_vm5 = vcmp.eq.s32.totalorder %v736_v63, 1 }
 0x1b0   : > { %1201 = vmatpush1.msk.msra.mxu1 %vm593_vm2, %v576_v23  ;;  %vm518_vm9 = vcmp.eq.s32.totalorder %v516_v27, 1 }
 0x1b1   : > { %v530_v24 = vpop.permute.xlu1 %529  ;;  %1202 = vmatprep.subr.msk.mxu1 %vm1843_vm6, %v573_v53  ;;  %v448_v36 = vpop.permute.xlu0 %447  ;;  %vm483_vm13 = vcmp.eq.s32.totalorder %v481_v1, 1  ;;  %vm482_vm15 = vcmp.eq.s32.totalorder %v477_v34, 1  ;;  %vm737_vm6 = vcmp.eq.s32.totalorder %v732_v30, 1  ;;  %v850_v1 = vld [vmem:[%s2086_s6 + $0x18] sm:$0xff] }
 0x1b2   : > { %v533_v47 = vsel %vm531_vm8, %v526_v46, %v530_v24  ;;  %v535_v48 = vsel %vm531_vm8, %v530_v24, %v526_v46  ;;  %1203 = vmatpush1.msk.msra.mxu1 %vm593_vm2, %v575_v55 }
 0x1b3   : > { %1204 = vmatprep.subr.msk.mxu1 %vm559_vm10, %v533_v47  ;;  %v854_v47 = vld [vmem:[%s2086_s6 + $0x38] sm:$0xff] }
 0x1b4   : > { %1205 = vmatpush1.msk.msra.mxu1 %vm558_vm11, %v535_v48  ;;  %v848_v48 = vld [vmem:[%s2086_s6 + $0x8] sm:$0xff] }
 0x1b5   : > { %v495_v25 = vpop.permute.xlu1 %494  ;;  %1206 = vmatprep.subr.msk.mxu1 %vm559_vm10, %v532_v56  ;;  %v709_v40 = vpop.permute.xlu0 %708  ;;  %v849_v56 = vld [vmem:[%s2086_s6 + $0x10] sm:$0xff] }
 0x1b6   : > { %v498_v41 = vsel %vm496_vm3, %v491_v29, %v495_v25  ;;  %v500_v62 = vsel %vm496_vm3, %v495_v25, %v491_v29  ;;  %1207 = vmatpush1.msk.msra.mxu1 %vm558_vm11, %v534_v26  ;;  %v852_v26 = vld [vmem:[%s2086_s6 + $0x28] sm:$0xff] }
 0x1b7   : > { %1208 = vmatprep.subr.msk.mxu1 %vm518_vm9, %v498_v41 }
 0x1b8   : > { %1209 = vmatpush1.msk.msra.mxu1 %vm517_vm12, %v500_v62 }
 0x1b9   : > { %v452_v44 = vpop.permute.xlu1 %451  ;;  %1210 = vmatprep.subr.msk.mxu1 %vm518_vm9, %v497_v60  ;;  %v707_v43 = vpop.permute.xlu0 %706 }
 0x1ba   : > { %v457_v50 = vsel %vm455_vm14, %v448_v36, %v452_v44  ;;  %v459_v51 = vsel %vm455_vm14, %v452_v44, %v448_v36  ;;  %1211 = vmatpush1.msk.msra.mxu1 %vm517_vm12, %v499_v42  ;;  %v853_v36 = vld [vmem:[%s2086_s6 + $0x30] sm:$0xff] }
 0x1bb   : > { %1212 = vmatprep.subr.msk.mxu1 %vm483_vm13, %v457_v50 }
 0x1bc   : > { %1213 = vmatpush1.msk.msra.mxu1 %vm482_vm15, %v459_v51 }
 0x1bd   : > { %v713_v45 = vpop.permute.xlu1 %712  ;;  %1214 = vmatprep.subr.msk.mxu1 %vm483_vm13, %v456_v20 }
 0x1be   : > { %v716_v11 = vsel %vm714_vm0, %v709_v40, %v713_v45  ;;  %v718_v46 = vsel %vm714_vm0, %v713_v45, %v709_v40  ;;  %1215 = vmatpush1.msk.msra.mxu1 %vm482_vm15, %v458_v22 }
 0x1bf   : > { %1216 = vmatprep.subr.msk.mxu1 %vm738_vm5, %v718_v46 }
 0x1c0   : > { %1217 = vmatpush2.msk.msra.mxu1 %vm737_vm6, %v716_v11 }
 0x1c1   : > { %v711_v58 = vpop.permute.xlu1 %710 }
 0x1c2   : > { %v715_v52 = vsel %vm714_vm0, %v707_v43, %v711_v58  ;;  %v717_v57 = vsel %vm714_vm0, %v711_v58, %v707_v43 }
 0x1c3   : > { %1218 = vmatprep.subr.msk.mxu1 %vm738_vm5, %v717_v57 }
 0x1c4   : > { %1219 = vmatpush2.msk.msra.mxu1 %vm737_vm6, %v715_v52  ;;  %v757_v33 = vpop.permute.xlu0 %756 }
 0x1c5   : > { %831 = vmatmul.mubr.f32.vlgmr.msra.gmra.mxu1 %v743_v39 }
 0x1c6   : > { %1221 = vmatprep.mubr.msk.f32.mxu1 %vm759_vm1, %v746_v54 }
 0x1c8   : > { %v866_v41 = vpop.permute.xlu0 %865 }
 0x1c9   : > { %837 = vmatmul.mubr.f32.gmra.mxu1 %v745_v37 }
 0x1ca   : > { %1033 = vmatprep.mubr.f32.mxu1 %v1399_v0 }
 0x1cc   : > { %v876_v39 = vpop.permute.xlu0 %875 }
 0x1ce   : > { %v752_v21 = vpop.permute.xlu1 %751 }
 0x1d2   : > { %v871_v25 = vpop.permute.xlu1 %870 }
 0x1d6   : > { %v881_v34 = vpop.permute.xlu1 %880 }
 0x1da   : > { %v1990_v38 = vpop.permute.xlu1 %890 }
 0x1de   : > { %v901_v62 = vpop.permute.xlu1 %900 }
 0x285   : > { %v832_v31 = vpop.f32.mrf.mxu1 }
 0x286   : > { %v833_v49 = vadd.f32 %v832_v31, %v752_v21 }
 0x287   : > { %v834_v61 = vpop.f32.mrf.mxu1 }
 0x288   : > { %v835_v53 = vadd.f32 %v834_v61, %v752_v21  ;;  %v843_v28 = vmax.f32 %v833_v49, 0.0 }
 0x289   : > { %v838_v35 = vpop.f32.mrf.mxu1 }
 0x28a   : > { %v839_v23 = vadd.f32 %v838_v35, %v757_v33  ;;  %v844_v14 = vmax.f32 %v835_v53, 0.0 }
 0x28b   : > { %v840_v29 = vpop.f32.mrf.mxu1 }
 0x28c   : > { %v841_v27 = vadd.f32 %v840_v29, %v757_v33  ;;  %v845_v24 = vmax.f32 %v839_v23, 0.0 }
 0x28e   : > { %v846_v55 = vmax.f32 %v841_v27, 0.0 }
 0x290   : > { %955 = vmatprep.subr.mxu0 %v846_v55  ;;  %1237 = vmatprep.subr.mxu1 %v846_v55 }
 0x291   : > { %956 = vmatpush1.msra.mxu0 %v845_v24  ;;  %1239 = vmatpush1.msra.mxu1 %v845_v24  ;;  %v886_v24 = vpop.permute.xlu0 %885 }
 0x292   : > { %957 = vmatprep.subr.mxu0 %v844_v14  ;;  %1238 = vmatprep.subr.mxu1 %v844_v14 }
 0x293   : > { %958 = vmatpush1.msra.mxu0 %v843_v28  ;;  %1240 = vmatpush1.msra.mxu1 %v843_v28 }
 0x294   : > { %1222 = vmatmul.mubr.msk.f32.vlgmr.msra.gmra.mxu0 %vm759_vm1, %v847_v32  ;;  %1229 = vmatmul.mubr.msk.f32.vlgmr.msra.gmra.mxu1 %vm759_vm1, %v854_v47 }
 0x295   : > { %997 = vmatprep.mubr.f32.mxu0 %v1399_v0 }
 0x298   : > { %1223 = vmatmul.mubr.msk.f32.gmra.mxu0 %vm759_vm1, %v848_v48 }
 0x299   : > { %1003 = vmatprep.mubr.f32.mxu0 %v1399_v0 }
 0x29c   : > { %1224 = vmatmul.mubr.msk.f32.gmra.mxu0 %vm759_vm1, %v849_v56 }
 0x29d   : > { %1009 = vmatprep.mubr.f32.mxu0 %v1399_v0 }
 0x2a0   : > { %1225 = vmatmul.mubr.msk.f32.gmra.mxu0 %vm759_vm1, %v850_v1 }
 0x2a1   : > { %1015 = vmatprep.mubr.f32.mxu0 %v1399_v0 }
 0x2a4   : > { %1226 = vmatmul.mubr.msk.f32.gmra.mxu0 %vm759_vm1, %v851_v59 }
 0x2a5   : > { %1021 = vmatprep.mubr.f32.mxu0 %v1399_v0 }
 0x2a8   : > { %1227 = vmatmul.mubr.msk.f32.gmra.mxu0 %vm759_vm1, %v852_v26 }
 0x2a9   : > { %1027 = vmatprep.mubr.f32.mxu0 %v1399_v0 }
 0x2ac   : > { %1228 = vmatmul.mubr.msk.f32.gmra.mxu0 %vm759_vm1, %v853_v36 }
 0x354   : > { %v993_v60 = vpop.f32.mrf.mxu0  ;;  %v1035_v63 = vpop.f32.mrf.mxu1 }
 0x355   : > { %v994_v42 = vadd.f32 %v993_v60, %v866_v41  ;;  %v1036_v44 = vadd.f32 %v1035_v63, %v901_v62 }
 0x356   : > { %v995_v30 = vpop.f32.mrf.mxu0  ;;  %v1037_v50 = vpop.f32.mrf.mxu1 }
 0x357   : > { %v1040_v0 = vadd.f32 %v994_v42, %v1632_v19  ;;  %v1054_v51 = vadd.f32 %v1036_v44, %v1571_v3  ;;  %v996_v40 = vadd.f32 %v995_v30, %v866_v41  ;;  %v1038_v20 = vadd.f32 %v1037_v50, %v901_v62 }
 0x358   : > { %v999_v22 = vpop.f32.mrf.mxu0 }
 0x359   : > { %v1056_v45 = vmax.f32 %v1040_v0, 0.0  ;;  %v1070_v11 = vmax.f32 %v1054_v51, 0.0  ;;  %v1041_v46 = vadd.f32 %v996_v40, %v1628_v18  ;;  %v1055_v43 = vadd.f32 %v1038_v20, %v1568_v2 }
 0x35a   : > { %v1000_v58 = vadd.f32 %v999_v22, %v871_v25  ;;  %v1001_v52 = vpop.f32.mrf.mxu0 }
 0x35b   : > { %1072 = vst [vmem:[%s1998_s20] sm:$0xff] %v1056_v45  ;;  %1086 = vst [vmem:[%s1998_s20 + $0x70] sm:$0xff] %v1070_v11  ;;  %v1057_v3 = vmax.f32 %v1041_v46, 0.0  ;;  %v1071_v19 = vmax.f32 %v1055_v43, 0.0  ;;  %v1002_v57 = vadd.f32 %v1001_v52, %v871_v25 }
 0x35c   : > { %v1042_v18 = vadd.f32 %v1000_v58, %v1624_v17  ;;  %v1005_v2 = vpop.f32.mrf.mxu0 }
 0x35d   : > { %1073 = vst [vmem:[%s1998_s20 + $0x8] sm:$0xff] %v1057_v3  ;;  %1087 = vst [vmem:[%s1998_s20 + $0x78] sm:$0xff] %v1071_v19  ;;  %v1043_v54 = vadd.f32 %v1002_v57, %v1620_v16  ;;  %v1006_v37 = vadd.f32 %v1005_v2, %v876_v39 }
 0x35e   : > { %v1058_v31 = vmax.f32 %v1042_v18, 0.0  ;;  %v1007_v61 = vpop.f32.mrf.mxu0 }
 0x35f   : > { %v1059_v35 = vmax.f32 %v1043_v54, 0.0  ;;  %v1044_v33 = vadd.f32 %v1006_v37, %v1616_v15  ;;  %v1008_v21 = vadd.f32 %v1007_v61, %v876_v39 }
 0x360   : > { %1074 = vst [vmem:[%s1998_s20 + $0x10] sm:$0xff] %v1058_v31  ;;  %v1011_v23 = vpop.f32.mrf.mxu0 }
 0x361   : > { %1075 = vst [vmem:[%s1998_s20 + $0x18] sm:$0xff] %v1059_v35  ;;  %v1060_v29 = vmax.f32 %v1044_v33, 0.0  ;;  %v1045_v17 = vadd.f32 %v1008_v21, %v1609_v13  ;;  %v1012_v53 = vadd.f32 %v1011_v23, %v881_v34 }
 0x362   : > { %v1013_v27 = vpop.f32.mrf.mxu0 }
 0x363   : > { %1076 = vst [vmem:[%s1998_s20 + $0x20] sm:$0xff] %v1060_v29  ;;  %v1061_v16 = vmax.f32 %v1045_v17, 0.0  ;;  %v1046_v49 = vadd.f32 %v1012_v53, %v1605_v12  ;;  %v1014_v55 = vadd.f32 %v1013_v27, %v881_v34 }
 0x364   : > { %v1017_v14 = vpop.f32.mrf.mxu0 }
 0x365   : > { %1077 = vst [vmem:[%s1998_s20 + $0x28] sm:$0xff] %v1061_v16  ;;  %v1062_v15 = vmax.f32 %v1046_v49, 0.0  ;;  %v1047_v28 = vadd.f32 %v1014_v55, %v1598_v10  ;;  %v1018_v32 = vadd.f32 %v1017_v14, %v886_v24 }
 0x366   : > { %v1019_v47 = vpop.f32.mrf.mxu0 }
 0x367   : > { %1078 = vst [vmem:[%s1998_s20 + $0x30] sm:$0xff] %v1062_v15  ;;  %v1063_v13 = vmax.f32 %v1047_v28, 0.0  ;;  %v1048_v48 = vadd.f32 %v1018_v32, %v1594_v9  ;;  %v1020_v56 = vadd.f32 %v1019_v47, %v886_v24  ;;  %v896_v9 = vpop.permute.xlu0 %895 }
 0x368   : > { %v1023_v1 = vpop.f32.mrf.mxu0 }
 0x369   : > { %1079 = vst [vmem:[%s1998_s20 + $0x38] sm:$0xff] %v1063_v13  ;;  %v1064_v12 = vmax.f32 %v1048_v48, 0.0  ;;  %v1049_v59 = vadd.f32 %v1020_v56, %v1590_v8  ;;  %v1024_v26 = vadd.f32 %v1023_v1, %v1990_v38 }
 0x36a   : > { %v1025_v36 = vpop.f32.mrf.mxu0 }
 0x36b   : > { %1080 = vst [vmem:[%s1998_s20 + $0x40] sm:$0xff] %v1064_v12  ;;  %v1065_v10 = vmax.f32 %v1049_v59, 0.0  ;;  %v1050_v25 = vadd.f32 %v1024_v26, %v1586_v7  ;;  %v1026_v34 = vadd.f32 %v1025_v36, %v1990_v38 }
 0x36c   : > { %v1029_v41 = vpop.f32.mrf.mxu0 }
 0x36d   : > { %1081 = vst [vmem:[%s1998_s20 + $0x48] sm:$0xff] %v1065_v10  ;;  %v1066_v62 = vmax.f32 %v1050_v25, 0.0  ;;  %v1051_v60 = vadd.f32 %v1026_v34, %v1582_v6  ;;  %v1030_v8 = vadd.f32 %v1029_v41, %v896_v9 }
 0x36e   : > { %v1031_v63 = vpop.f32.mrf.mxu0 }
 0x36f   : > { %1082 = vst [vmem:[%s1998_s20 + $0x50] sm:$0xff] %v1066_v62  ;;  %v1067_v42 = vmax.f32 %v1051_v60, 0.0  ;;  %v1052_v44 = vadd.f32 %v1030_v8, %v1578_v5  ;;  %v1032_v30 = vadd.f32 %v1031_v63, %v896_v9 }
 0x371   : > { %1083 = vst [vmem:[%s1998_s20 + $0x58] sm:$0xff] %v1067_v42  ;;  %v1068_v7 = vmax.f32 %v1052_v44, 0.0  ;;  %v1053_v38 = vadd.f32 %v1032_v30, %v1574_v4 }
 0x373   : > { %1084 = vst [vmem:[%s1998_s20 + $0x60] sm:$0xff] %v1068_v7  ;;  %v1069_v6 = vmax.f32 %v1053_v38, 0.0 }
 0x375   : > { %1085 = vst [vmem:[%s1998_s20 + $0x68] sm:$0xff] %v1069_v6 }
 0x376   : > { %1343 = shalt.err (!%p1340_p9)
}
 0x377   : > { %s1344_s19 = scalar_lea.hbm %s2033_s15, 2048  ;;  %s1348_s21 = scalar_lea.hbm %s2088_s8, 16384 }
 0x378   : > { %p1345_p13 = scmp.ne.s32.totalorder %s2033_s15, %s1344_s19  ;;  %p1349_p2 = scmp.lt.s32.totalorder %s2033_s15, %s2088_s8 }
 0x379   : > { %p1350_p3 = scmp.lt.s32.totalorder %s1348_s21, %s1344_s19 }
 0x37a   : > { %p1346_p1 = pnand %p1345_p13, %p2106_p11 }
 0x37b   : > { %p1351_p6 = por %p1350_p3, %p1349_p2 }
 0x37c   : > { %p1347_p0 = pneg %p1346_p1 }
 0x37e   : > { %p1352_p10 = pnand %p1351_p6, %p1347_p0 }
 0x380   : > { %1355 = shalt.err (!%p1352_p10)
}
 0x381   : > { %s1410_s9 = smov 256  }
 0x382   : > { %1243 = dma.vmem_to_hbm [thread:$0]  (%p2106_p11), %s2036_s13, 2048, %s2033_s15, %s1089_s23, %s1410_s9, %s1410_s9, %s1406_s24  }
 0x383 PF: > { %p1254_p12 = scmp.ge.s32.totalorder %s1394_s30, 2  ;;  %s1117_s16 = sand.u32 1, %s1382_s27  }
 0x384   : > { %p2107_p4 = scmp.ne.s32.totalorder %s2095_s18, 0  ;;  %s1118_s12 = scalar_lea.sflag [#allocation4], %s1117_s16 }
 0x386   : > { %p1250_p5 = pnand %p1254_p12, %p2107_p4 }
 0x388   : > { %p1251_p7 = pneg %p1250_p5 }
 0x38a   : > { %1377 = dma.done.wait (%p1251_p7), %s1118_s12, 2048  }
 0x38b   : > { %1379 = vsyncadd (%p1251_p7), %s1118_s12, 4294965248  ;;  %s2108_s17 = sld [smem:[#allocation8_spill]]  ;;  %p21_p8 = scmp.ge.s32.totalorder %s1481_s11, 10  }
 0x38c   : > { %s2109_s27 = smov %s1386_s28  ;;  %s2110_s28 = smov %s1390_s29 }
 0x38d   : > { %s2112_s30 = smov %s1481_s11  ;;  %23 = sbr.rel (!%p21_p8) target bundleno = 5 (0x5), region = 97 }
 0x391   : > { %s2111_s29 = smov %s2108_s17 }
 0x392   :  { %1123 = vsyncpa [#allocation3], 1 }
 0x393   :  { %1125 = vsyncpa [#allocation3 + $0x1], 1 }
 0x394   :  { %1126 = vsyncpa [#allocation4], 1 }
 0x395   :  { %1128 = vsyncpa [#allocation4 + $0x1], 1 }

</bundles_post_ra>
